<compile_context>
chip_gen: v5e
topology: v5e:2x2
jax: 0.10.0
libtpu: 0.0.40
codegen_flags: <defaults>
</compile_context>

<pallas_src>
import functools

import jax
import jax.numpy as jnp
from jax.experimental import pallas as pl
from jax.experimental.pallas import tpu as pltpu


def _round_up(n: int, m: int) -> int:
    return ((n + m - 1) // m) * m


def _matmul_kernel(x_ref, w_ref, o_ref, acc_ref):
    """One (tm, tn) output tile; accumulate over the E (reduction) grid axis."""
    k = pl.program_id(2)

    @pl.when(k == 0)
    def _():
        acc_ref[...] = jnp.zeros_like(acc_ref)

    acc_ref[...] += jnp.dot(
        x_ref[...], w_ref[...], preferred_element_type=jnp.float32
    )

    @pl.when(k == pl.num_programs(2) - 1)
    def _():
        o_ref[...] = acc_ref[...].astype(o_ref.dtype)


@functools.partial(jax.jit, static_argnames=("tm", "tn", "tk"))
def classification_head(x, w, *, tm=128, tn=128, tk=256):
    """Forward of ClassificationHead: y = x @ W^T.

    x: [B, E] activations.
    w: [C, E] weight in PyTorch nn.Linear layout (num_classes, emb_dim).
    Returns y: [B, C] in x.dtype.
    """
    B, E = x.shape
    C, E2 = w.shape
    assert E == E2, f"emb_dim mismatch: {E} vs {E2}"
    out_dtype = x.dtype

    # bf16 operands for the MXU; f32 accumulation inside the kernel.
    x_bf = x.astype(jnp.bfloat16)
    w_t = jnp.transpose(w).astype(jnp.bfloat16)  # [E, C]

    # Pad every dim to its tile size (tn is a multiple of 128 -> lane-dense
    # output stores; zero padding is exact for a bias-free matmul).
    Bp = _round_up(B, tm)
    Ep = _round_up(E, tk)
    Cp = _round_up(C, tn)
    x_p = jnp.pad(x_bf, ((0, Bp - B), (0, Ep - E)))
    w_p = jnp.pad(w_t, ((0, Ep - E), (0, Cp - C)))

    grid = (Bp // tm, Cp // tn, Ep // tk)

    cost = pl.CostEstimate(
        flops=2 * Bp * Ep * Cp,
        transcendentals=0,
        bytes_accessed=(x_p.size * 2 + w_p.size * 2
                        + Bp * Cp * jnp.dtype(out_dtype).itemsize),
    )

    y_p = pl.pallas_call(
        _matmul_kernel,
        out_shape=jax.ShapeDtypeStruct((Bp, Cp), out_dtype),
        grid_spec=pltpu.PrefetchScalarGridSpec(
            num_scalar_prefetch=0,
            grid=grid,
            in_specs=[
                pl.BlockSpec((tm, tk), lambda i, j, k: (i, k)),  # x tile
                pl.BlockSpec((tk, tn), lambda i, j, k: (k, j)),  # W tile
            ],
            out_specs=pl.BlockSpec((tm, tn), lambda i, j, k: (i, j)),
            scratch_shapes=[pltpu.VMEM((tm, tn), jnp.float32)],
        ),
        compiler_params=pltpu.CompilerParams(
            dimension_semantics=("parallel", "parallel", "arbitrary"),
            vmem_limit_bytes=32 * 1024 * 1024,
        ),
        cost_estimate=cost,
    )(x_p, w_p)

    return y_p[:B, :C]


if __name__ == "__main__":
    emb_dim = 32
    num_classes = 8
    batch = 2

    key = jax.random.PRNGKey(0)
    kx, kw = jax.random.split(key)

    # Deterministic synthetic parameters (nn.Linear weight: [num_classes, emb_dim]).
    w = jax.random.normal(kw, (num_classes, emb_dim), dtype=jnp.float32) * 0.02
    x = jax.random.normal(kx, (batch, emb_dim), dtype=jnp.float32)

    y = classification_head(x, w)
    y = jax.block_until_ready(y)

    # Reference (same math as PyTorch nn.Linear, bias=False): x @ W^T.
    y_ref = x @ w.T
    assert y.shape == (batch, num_classes)
    # bf16 operands -> looser tolerance than pure-f32.
    assert jnp.allclose(y, y_ref, atol=1e-2, rtol=1e-2), (
        f"max abs err {jnp.max(jnp.abs(y - y_ref))}"
    )

    print("KERNEL_OK")
</pallas_src>

<mosaic_0001>
module attributes {stable_mosaic.version = 11 : i64} {
  func.func @_matmul_kernel(%arg0: i32, %arg1: i32, %arg2: i32, %arg3: memref<128x256xbf16, #tpu.memory_space<vmem>>, %arg4: memref<256x128xbf16, #tpu.memory_space<vmem>>, %arg5: memref<128x128xf32, #tpu.memory_space<vmem>>, %arg6: memref<128x128xf32, #tpu.memory_space<vmem>>) attributes {dimension_semantics = [#tpu.dimension_semantics<parallel>, #tpu.dimension_semantics<parallel>, #tpu.dimension_semantics<arbitrary>], iteration_bounds = array<i64: 1, 1, 1>, scalar_prefetch = 0 : i64, scratch_operands = 1 : i64, tpu.core_type = #tpu.core_type<tc>, window_params = [{transform_indices = @transform_0, window_bounds = array<i64: 128, 256>}, {transform_indices = @transform_1, window_bounds = array<i64: 256, 128>}, {transform_indices = @transform_2, window_bounds = array<i64: 128, 128>}]} {
    %c0_i32 = arith.constant 0 : i32
    %0 = arith.cmpi eq, %arg2, %c0_i32 : i32
    %1 = arith.extui %0 : i1 to i32
    %c0_i32_0 = arith.constant 0 : i32
    %2 = arith.cmpi ne, %1, %c0_i32_0 : i32
    scf.if %2 {
      %cst_10 = arith.constant 0.000000e+00 : f32
      %12 = vector.broadcast %cst_10 : f32 to vector<128x128xf32>
      %c0_11 = arith.constant 0 : index
      %c0_12 = arith.constant 0 : index
      %13 = vector.load %arg6[%c0_11, %c0_12] : memref<128x128xf32, #tpu.memory_space<vmem>>, vector<128x128xf32>
      tpu.vector_store %arg6[%c0_11, %c0_12], %12 {strides = array<i32>} : memref<128x128xf32, #tpu.memory_space<vmem>>, vector<128x128xf32>,
    } else {
    }
    %c0 = arith.constant 0 : index
    %c0_1 = arith.constant 0 : index
    %3 = vector.load %arg6[%c0, %c0_1] : memref<128x128xf32, #tpu.memory_space<vmem>>, vector<128x128xf32>
    %c0_2 = arith.constant 0 : index
    %c0_3 = arith.constant 0 : index
    %4 = vector.load %arg3[%c0_2, %c0_3] : memref<128x256xbf16, #tpu.memory_space<vmem>>, vector<128x256xbf16>
    %c0_4 = arith.constant 0 : index
    %c0_5 = arith.constant 0 : index
    %5 = vector.load %arg4[%c0_4, %c0_5] : memref<256x128xbf16, #tpu.memory_space<vmem>>, vector<256x128xbf16>
    %cst = arith.constant dense<0.000000e+00> : vector<128x128xf32>
    %6 = tpu.matmul %4, %5, %cst {dimension_numbers = #tpu.dot_dimension_numbers<[1], [0], [0], [1], [0, 0, 1, 1], [], []>} : vector<128x256xbf16>, vector<256x128xbf16>, vector<128x128xf32> -> vector<128x128xf32>
    %7 = arith.addf %3, %6 : vector<128x128xf32>
    %c0_6 = arith.constant 0 : index
    %c0_7 = arith.constant 0 : index
    %8 = vector.load %arg6[%c0_6, %c0_7] : memref<128x128xf32, #tpu.memory_space<vmem>>, vector<128x128xf32>
    tpu.vector_store %arg6[%c0_6, %c0_7], %7 {strides = array<i32>} : memref<128x128xf32, #tpu.memory_space<vmem>>, vector<128x128xf32>,
    %c0_i32_8 = arith.constant 0 : i32
    %9 = arith.cmpi eq, %arg2, %c0_i32_8 : i32
    %10 = arith.extui %9 : i1 to i32
    %c0_i32_9 = arith.constant 0 : i32
    %11 = arith.cmpi ne, %10, %c0_i32_9 : i32
    scf.if %11 {
      %c0_10 = arith.constant 0 : index
      %c0_11 = arith.constant 0 : index
      %12 = vector.load %arg6[%c0_10, %c0_11] : memref<128x128xf32, #tpu.memory_space<vmem>>, vector<128x128xf32>
      %c0_12 = arith.constant 0 : index
      %c0_13 = arith.constant 0 : index
      %13 = vector.load %arg5[%c0_12, %c0_13] : memref<128x128xf32, #tpu.memory_space<vmem>>, vector<128x128xf32>
      tpu.vector_store %arg5[%c0_12, %c0_13], %12 {strides = array<i32>} : memref<128x128xf32, #tpu.memory_space<vmem>>, vector<128x128xf32>,
    } else {
    }
    return
  }
  func.func @transform_0(%arg0: i32, %arg1: i32, %arg2: i32) -> (i32, i32) {
    %c0_i32 = arith.constant 0 : i32
    return %arg0, %arg2 : i32, i32
  }
  func.func @transform_1(%arg0: i32, %arg1: i32, %arg2: i32) -> (i32, i32) {
    %c0_i32 = arith.constant 0 : i32
    return %arg2, %arg1 : i32, i32
  }
  func.func @transform_2(%arg0: i32, %arg1: i32, %arg2: i32) -> (i32, i32) {
    %c0_i32 = arith.constant 0 : i32
    return %arg0, %arg1 : i32, i32
  }
}

</mosaic_0001>

<bundles_post_ra>
// kernel: classification_head.1
= control target key start
LH: loop header
LB: loop body
LE: loop exit
PB: predicated region body
PF: predicated region fallthrough
CT: control target
= control target key end

     0   :  { %s823_s1 = inlined_call_operand.vmem [shape: bf16[256,128], index: 1, kind: input, shape index: {}]   ;;  %s824_s0 = inlined_call_operand.vmem [shape: bf16[128,256], index: 0, kind: input, shape index: {}]   ;;  %s825_s2 = inlined_call_operand.vmem [shape: f32[128,128], index: 2, kind: output, shape index: {}]  }
   0x1   :  { %v591_v0 = vld [vmem:[%s823_s1 + $0x38] sm:$0xff]  ;;  %v590_v2 = vld [vmem:[%s823_s1 + $0x30] sm:$0xff]  ;;  %v589_v4 = vld [vmem:[%s823_s1 + $0x28] sm:$0xff] }
   0x2   :  { %v599_v1 = vld [vmem:[%s823_s1 + $0x78] sm:$0xff]  ;;  %271 = vmatpush.bf16.msra.mxu0 %v591_v0  ;;  %600 = vmatpush.bf16.msra.mxu2 %v591_v0  ;;  %v598_v3 = vld [vmem:[%s823_s1 + $0x70] sm:$0xff]  ;;  %v597_v5 = vld [vmem:[%s823_s1 + $0x68] sm:$0xff] }
   0x3   :  { %320 = vmatpush.bf16.msra.mxu1 %v599_v1  ;;  %608 = vmatpush.bf16.msra.mxu3 %v599_v1  ;;  %v588_v6 = vld [vmem:[%s823_s1 + $0x20] sm:$0xff]  ;;  %v587_v8 = vld [vmem:[%s823_s1 + $0x18] sm:$0xff]  ;;  %v586_v10 = vld [vmem:[%s823_s1 + $0x10] sm:$0xff] }
   0x4   :  { %v596_v7 = vld [vmem:[%s823_s1 + $0x60] sm:$0xff]  ;;  %v595_v9 = vld [vmem:[%s823_s1 + $0x58] sm:$0xff]  ;;  %v594_v11 = vld [vmem:[%s823_s1 + $0x50] sm:$0xff] }
   0x5   :  { %v585_v12 = vld [vmem:[%s823_s1 + $0x8] sm:$0xff]  ;;  %v584_v14 = vld [vmem:[%s823_s1] sm:$0xff]  ;;  %v450_v28 = vld [vmem:[%s824_s0 + $0x10] sm:$0xf] }
   0x6   :  { %272 = vmatpush.bf16.msra.mxu0 %v590_v2  ;;  %601 = vmatpush.bf16.msra.mxu2 %v590_v2  ;;  %v593_v13 = vld [vmem:[%s823_s1 + $0x48] sm:$0xff]  ;;  %v592_v15 = vld [vmem:[%s823_s1 + $0x40] sm:$0xff]  ;;  %v571_v29 = vld [vmem:[%s824_s0 + $0x14] sm:$0xf0] }
   0x7   :  { %321 = vmatpush.bf16.msra.mxu1 %v598_v3  ;;  %609 = vmatpush.bf16.msra.mxu3 %v598_v3  ;;  %v442_v16 = vld [vmem:[%s824_s0] sm:$0xf]  ;;  %v569_v17 = vld [vmem:[%s824_s0 + $0x4] sm:$0xf0]  ;;  %v568_v20 = vld [vmem:[%s824_s0 + $0x4] sm:$0xf]  ;;  %v451_v36 = vor.u32 %v571_v29, %v450_v28 }
   0x8   :  { %v474_v18 = vld [vmem:[%s824_s0 + $0x40] sm:$0xf]  ;;  %v577_v19 = vld [vmem:[%s824_s0 + $0x44] sm:$0xf0]  ;;  %v444_v21 = vld [vmem:[%s824_s0 + $0x8] sm:$0xf0]  ;;  %v443_v24 = vor.u32 %v569_v17, %v442_v16 }
   0x9   :  { %v576_v22 = vld [vmem:[%s824_s0 + $0x44] sm:$0xf]  ;;  %v476_v23 = vld [vmem:[%s824_s0 + $0x48] sm:$0xf0]  ;;  %v475_v25 = vor.u32 %v577_v19, %v474_v18  ;;  %v447_v26 = vor.u32 %v568_v20, %v444_v21  ;;  %v482_v30 = vld [vmem:[%s824_s0 + $0x50] sm:$0xf] }
   0xa   :  { %273 = vmatpush.bf16.msra.mxu0 %v589_v4  ;;  %602 = vmatpush.bf16.msra.mxu2 %v589_v4  ;;  %v479_v27 = vor.u32 %v576_v22, %v476_v23  ;;  %v579_v31 = vld [vmem:[%s824_s0 + $0x54] sm:$0xf0]  ;;  %v570_v32 = vld [vmem:[%s824_s0 + $0x14] sm:$0xf]  ;;  %v452_v33 = vld [vmem:[%s824_s0 + $0x18] sm:$0xf0] }
   0xb   :  { %322 = vmatpush.bf16.msra.mxu1 %v597_v5  ;;  %610 = vmatpush.bf16.msra.mxu3 %v597_v5  ;;  %v578_v34 = vld [vmem:[%s824_s0 + $0x54] sm:$0xf]  ;;  %v484_v35 = vld [vmem:[%s824_s0 + $0x58] sm:$0xf0]  ;;  %v483_v37 = vor.u32 %v579_v31, %v482_v30  ;;  %v455_v38 = vor.u32 %v570_v32, %v452_v33  ;;  %v458_v40 = vld [vmem:[%s824_s0 + $0x20] sm:$0xf] }
   0xc   :  { %v487_v39 = vor.u32 %v578_v34, %v484_v35  ;;  %v573_v41 = vld [vmem:[%s824_s0 + $0x24] sm:$0xf0]  ;;  %v490_v42 = vld [vmem:[%s824_s0 + $0x60] sm:$0xf]  ;;  %v572_v44 = vld [vmem:[%s824_s0 + $0x24] sm:$0xf] }
   0xd   :  { %v581_v43 = vld [vmem:[%s824_s0 + $0x64] sm:$0xf0]  ;;  %v460_v45 = vld [vmem:[%s824_s0 + $0x28] sm:$0xf0]  ;;  %v580_v46 = vld [vmem:[%s824_s0 + $0x64] sm:$0xf]  ;;  %v459_v48 = vor.u32 %v573_v41, %v458_v40 }
   0xe   :  { %274 = vmatpush.bf16.msra.mxu0 %v588_v6  ;;  %603 = vmatpush.bf16.msra.mxu2 %v588_v6  ;;  %v492_v47 = vld [vmem:[%s824_s0 + $0x68] sm:$0xf0]  ;;  %v491_v49 = vor.u32 %v581_v43, %v490_v42  ;;  %v463_v50 = vor.u32 %v572_v44, %v460_v45  ;;  %v466_v52 = vld [vmem:[%s824_s0 + $0x30] sm:$0xf]  ;;  %v575_v53 = vld [vmem:[%s824_s0 + $0x34] sm:$0xf0] }
   0xf   :  { %323 = vmatpush.bf16.msra.mxu1 %v596_v7  ;;  %611 = vmatpush.bf16.msra.mxu3 %v596_v7  ;;  %v495_v51 = vor.u32 %v580_v46, %v492_v47  ;;  %v498_v54 = vld [vmem:[%s824_s0 + $0x70] sm:$0xf]  ;;  %v583_v55 = vld [vmem:[%s824_s0 + $0x74] sm:$0xf0]  ;;  %v574_v56 = vld [vmem:[%s824_s0 + $0x34] sm:$0xf]  ;;  %v467_v60 = vor.u32 %v575_v53, %v466_v52 }
  0x10   :  { %v468_v57 = vld [vmem:[%s824_s0 + $0x38] sm:$0xf0]  ;;  %v582_v58 = vld [vmem:[%s824_s0 + $0x74] sm:$0xf]  ;;  %v499_v61 = vor.u32 %v583_v55, %v498_v54 }
  0x11   :  { %v500_v59 = vld [vmem:[%s824_s0 + $0x78] sm:$0xf0]  ;;  %v471_v62 = vor.u32 %v574_v56, %v468_v57 }
  0x12   :  { %275 = vmatpush.bf16.msra.mxu0 %v587_v8  ;;  %604 = vmatpush.bf16.msra.mxu2 %v587_v8  ;;  %v503_v63 = vor.u32 %v582_v58, %v500_v59 }
  0x13   :  { %324 = vmatpush.bf16.msra.mxu1 %v595_v9  ;;  %612 = vmatpush.bf16.msra.mxu3 %v595_v9 }
  0x16   :  { %276 = vmatpush.bf16.msra.mxu0 %v586_v10  ;;  %605 = vmatpush.bf16.msra.mxu2 %v586_v10 }
  0x17   :  { %325 = vmatpush.bf16.msra.mxu1 %v594_v11  ;;  %613 = vmatpush.bf16.msra.mxu3 %v594_v11 }
  0x1a   :  { %277 = vmatpush.bf16.msra.mxu0 %v585_v12  ;;  %606 = vmatpush.bf16.msra.mxu2 %v585_v12 }
  0x1b   :  { %326 = vmatpush.bf16.msra.mxu1 %v593_v13  ;;  %614 = vmatpush.bf16.msra.mxu3 %v593_v13 }
  0x1e   :  { %278 = vmatpush.bf16.msra.mxu0 %v584_v14  ;;  %607 = vmatpush.bf16.msra.mxu2 %v584_v14 }
  0x1f   :  { %327 = vmatpush.bf16.msra.mxu1 %v592_v15  ;;  %615 = vmatpush.bf16.msra.mxu3 %v592_v15 }
  0x21   :  { %279 = vmatmul.bf16.vlgmr.msra.gmra.mxu0 %v443_v24  ;;  %299 = vmatmul.bf16.vlgmr.msra.gmra.mxu2 %v475_v25 }
  0x22   :  { %328 = vmatmul.bf16.vlgmr.msra.gmra.mxu1 %v447_v26  ;;  %348 = vmatmul.bf16.vlgmr.msra.gmra.mxu3 %v479_v27 }
  0x31   :  { %284 = vmatmul.bf16.gmra.mxu0 %v451_v36  ;;  %304 = vmatmul.bf16.gmra.mxu2 %v483_v37 }
  0x32   :  { %333 = vmatmul.bf16.gmra.mxu1 %v455_v38  ;;  %353 = vmatmul.bf16.gmra.mxu3 %v487_v39 }
  0x41   :  { %289 = vmatmul.bf16.gmra.mxu0 %v459_v48  ;;  %309 = vmatmul.bf16.gmra.mxu2 %v491_v49 }
  0x42   :  { %338 = vmatmul.bf16.gmra.mxu1 %v463_v50  ;;  %358 = vmatmul.bf16.gmra.mxu3 %v495_v51 }
  0x51   :  { %294 = vmatmul.bf16.gmra.mxu0 %v467_v60  ;;  %314 = vmatmul.bf16.gmra.mxu2 %v499_v61 }
  0x52   :  { %343 = vmatmul.bf16.gmra.mxu1 %v471_v62  ;;  %363 = vmatmul.bf16.gmra.mxu3 %v503_v63 }
  0x9e   :  { %v280_v0 = vpop.f32.mrf.mxu0 }
  0x9f   :  { %v329_v1 = vpop.f32.mrf.mxu1 }
  0xa0   :  { %v330_v2 = vadd.f32 %v329_v1, %v280_v0 }
  0xa2   :  { %420 = vst [vmem:[%s825_s2] sm:$0xff] %v330_v2 }
  0xa4   :  { %v300_v3 = vpop.f32.mrf.mxu2 }
  0xa5   :  { %v349_v4 = vpop.f32.mrf.mxu3 }
  0xa6   :  { %v350_v5 = vadd.f32 %v349_v4, %v300_v3  ;;  %v282_v6 = vpop.f32.mrf.mxu0 }
  0xa7   :  { %v331_v7 = vpop.f32.mrf.mxu1 }
  0xa8   :  { %428 = vst [vmem:[%s825_s2 + $0x40] sm:$0xff] %v350_v5  ;;  %v332_v8 = vadd.f32 %v331_v7, %v282_v6 }
  0xaa   :  { %421 = vst [vmem:[%s825_s2 + $0x8] sm:$0xff] %v332_v8 }
  0xac   :  { %v302_v9 = vpop.f32.mrf.mxu2 }
  0xad   :  { %v351_v10 = vpop.f32.mrf.mxu3 }
  0xae   :  { %v352_v11 = vadd.f32 %v351_v10, %v302_v9  ;;  %v285_v12 = vpop.f32.mrf.mxu0 }
  0xaf   :  { %v334_v13 = vpop.f32.mrf.mxu1 }
  0xb0   :  { %429 = vst [vmem:[%s825_s2 + $0x48] sm:$0xff] %v352_v11  ;;  %v335_v14 = vadd.f32 %v334_v13, %v285_v12 }
  0xb2   :  { %422 = vst [vmem:[%s825_s2 + $0x10] sm:$0xff] %v335_v14 }
  0xb4   :  { %v305_v15 = vpop.f32.mrf.mxu2 }
  0xb5   :  { %v354_v16 = vpop.f32.mrf.mxu3 }
  0xb6   :  { %v355_v17 = vadd.f32 %v354_v16, %v305_v15  ;;  %v287_v18 = vpop.f32.mrf.mxu0 }
  0xb7   :  { %v336_v19 = vpop.f32.mrf.mxu1 }
  0xb8   :  { %430 = vst [vmem:[%s825_s2 + $0x50] sm:$0xff] %v355_v17  ;;  %v337_v20 = vadd.f32 %v336_v19, %v287_v18 }
  0xba   :  { %423 = vst [vmem:[%s825_s2 + $0x18] sm:$0xff] %v337_v20 }
  0xbc   :  { %v307_v21 = vpop.f32.mrf.mxu2 }
  0xbd   :  { %v356_v22 = vpop.f32.mrf.mxu3 }
  0xbe   :  { %v357_v23 = vadd.f32 %v356_v22, %v307_v21  ;;  %v290_v24 = vpop.f32.mrf.mxu0 }
  0xbf   :  { %v339_v25 = vpop.f32.mrf.mxu1 }
  0xc0   :  { %431 = vst [vmem:[%s825_s2 + $0x58] sm:$0xff] %v357_v23  ;;  %v340_v26 = vadd.f32 %v339_v25, %v290_v24 }
  0xc2   :  { %424 = vst [vmem:[%s825_s2 + $0x20] sm:$0xff] %v340_v26 }
  0xc4   :  { %v310_v27 = vpop.f32.mrf.mxu2 }
  0xc5   :  { %v359_v28 = vpop.f32.mrf.mxu3 }
  0xc6   :  { %v360_v29 = vadd.f32 %v359_v28, %v310_v27  ;;  %v292_v30 = vpop.f32.mrf.mxu0 }
  0xc7   :  { %v341_v31 = vpop.f32.mrf.mxu1 }
  0xc8   :  { %432 = vst [vmem:[%s825_s2 + $0x60] sm:$0xff] %v360_v29  ;;  %v342_v32 = vadd.f32 %v341_v31, %v292_v30 }
  0xca   :  { %425 = vst [vmem:[%s825_s2 + $0x28] sm:$0xff] %v342_v32 }
  0xcc   :  { %v312_v33 = vpop.f32.mrf.mxu2 }
  0xcd   :  { %v361_v34 = vpop.f32.mrf.mxu3 }
  0xce   :  { %v362_v35 = vadd.f32 %v361_v34, %v312_v33  ;;  %v295_v36 = vpop.f32.mrf.mxu0 }
  0xcf   :  { %v344_v37 = vpop.f32.mrf.mxu1 }
  0xd0   :  { %433 = vst [vmem:[%s825_s2 + $0x68] sm:$0xff] %v362_v35  ;;  %v345_v38 = vadd.f32 %v344_v37, %v295_v36 }
  0xd2   :  { %426 = vst [vmem:[%s825_s2 + $0x30] sm:$0xff] %v345_v38 }
  0xd4   :  { %v315_v39 = vpop.f32.mrf.mxu2 }
  0xd5   :  { %v364_v40 = vpop.f32.mrf.mxu3 }
  0xd6   :  { %v365_v41 = vadd.f32 %v364_v40, %v315_v39  ;;  %v297_v42 = vpop.f32.mrf.mxu0 }
  0xd7   :  { %v346_v43 = vpop.f32.mrf.mxu1 }
  0xd8   :  { %434 = vst [vmem:[%s825_s2 + $0x70] sm:$0xff] %v365_v41  ;;  %v347_v44 = vadd.f32 %v346_v43, %v297_v42 }
  0xda   :  { %427 = vst [vmem:[%s825_s2 + $0x38] sm:$0xff] %v347_v44 }
  0xdc   :  { %v317_v45 = vpop.f32.mrf.mxu2 }
  0xdd   :  { %v366_v46 = vpop.f32.mrf.mxu3 }
  0xde   :  { %v367_v47 = vadd.f32 %v366_v46, %v317_v45 }
  0xe0   :  { %435 = vst [vmem:[%s825_s2 + $0x78] sm:$0xff] %v367_v47 }

</bundles_post_ra>
